<compile_context>
chip_gen: v7x
topology: tpu7x:2x2x1
jax: 0.10.0
libtpu: 0.0.40
codegen_flags: <defaults>
</compile_context>

<pallas_src>
import functools
import math

import jax
import jax.numpy as jnp
import numpy as np
from jax.experimental import pallas as pl
from jax.experimental.pallas import tpu as pltpu


# ----------------------------------------------------------------------------
# small helpers
# ----------------------------------------------------------------------------
def _round_up(v, m):
    return ((v + m - 1) // m) * m


def _pad2(a, rows, cols):
    pr, pc = rows - a.shape[0], cols - a.shape[1]
    if pr or pc:
        a = jnp.pad(a, ((0, pr), (0, pc)))
    return a


def _full_spec(shape):
    # whole-array block (block_shape == full dims satisfies the (8,128) rule)
    return pl.BlockSpec(shape, lambda: (0,) * len(shape))


def _maybe_vmem_limit(block_bytes):
    # BlockSpec double-buffers each operand; only raise above the ~32 MiB
    # default scoped limit.  Cap at 64 MiB (v7x physical VMEM) -- for graphs
    # bigger than that, shrink row_block instead.
    need = 2 * block_bytes + (4 << 20)
    if need > (32 << 20):
        return int(min(need, 64 << 20))
    return None


# ----------------------------------------------------------------------------
# Pallas kernels
# ----------------------------------------------------------------------------
def _vgae_fused_kernel(a_ref, x_ref, w1_ref, b1_ref, wh_ref, bh_ref, eps_ref,
                       z_ref, mu_ref, lv_ref, *, co_pad, mm_dtype):
    """Whole-graph fused forward (small N): 4 MXU matmuls + VPU/EUP tail."""
    a = a_ref[...].astype(mm_dtype)                                  # [N, N]

    # --- GCN layer 1 + ReLU (bias add / relu stay f32) ---------------------
    xw1 = jnp.dot(x_ref[...].astype(mm_dtype), w1_ref[...].astype(mm_dtype),
                  preferred_element_type=jnp.float32)                # [N, H]
    h = jnp.dot(a, xw1.astype(mm_dtype),
                preferred_element_type=jnp.float32) + b1_ref[...]
    h = jnp.maximum(h, 0.0)

    # --- fused mu|logvar heads: one [H, 2*Co] weight, one aggregation -------
    hw = jnp.dot(h.astype(mm_dtype), wh_ref[...].astype(mm_dtype),
                 preferred_element_type=jnp.float32)                 # [N, 2Co]
    mulv = jnp.dot(a, hw.astype(mm_dtype),
                   preferred_element_type=jnp.float32) + bh_ref[...]

    mu = mulv[:, :co_pad]                 # lane-aligned split (co_pad % 128 == 0)
    lv = mulv[:, co_pad:]

    # --- reparameterize (training mode), all f32 elementwise ----------------
    z = mu + eps_ref[...] * jnp.exp(0.5 * lv)

    z_ref[...] = z
    mu_ref[...] = mu
    lv_ref[...] = lv


def _vgae_rows_layer1_kernel(a_ref, x_ref, w1_ref, b1_ref, wh_ref, hw_ref,
                             *, mm_dtype):
    """Pass 1 (row-tiled): hw[slab] = relu(A_hat[slab,:] @ (x@W1) + b1) @ Wheads."""
    a = a_ref[...].astype(mm_dtype)                                  # [tm, N]
    xw1 = jnp.dot(x_ref[...].astype(mm_dtype), w1_ref[...].astype(mm_dtype),
                  preferred_element_type=jnp.float32)                # [N, H]
    h = jnp.dot(a, xw1.astype(mm_dtype),
                preferred_element_type=jnp.float32) + b1_ref[...]
    h = jnp.maximum(h, 0.0)                                          # [tm, H]
    hw_ref[...] = jnp.dot(h.astype(mm_dtype), wh_ref[...].astype(mm_dtype),
                          preferred_element_type=jnp.float32)        # [tm, 2Co]


def _vgae_rows_heads_kernel(a_ref, hw_ref, bh_ref, eps_ref,
                            z_ref, mu_ref, lv_ref, *, co_pad, mm_dtype):
    """Pass 2 (row-tiled): both heads aggregated with a single A_hat slab read."""
    a = a_ref[...].astype(mm_dtype)                                  # [tm, N]
    mulv = jnp.dot(a, hw_ref[...].astype(mm_dtype),
                   preferred_element_type=jnp.float32) + bh_ref[...]
    mu = mulv[:, :co_pad]
    lv = mulv[:, co_pad:]
    z = mu + eps_ref[...] * jnp.exp(0.5 * lv)
    z_ref[...] = z
    mu_ref[...] = mu
    lv_ref[...] = lv


# ----------------------------------------------------------------------------
# wrapper: padding, head fusion, dispatch (fused single block vs. row-tiled)
# ----------------------------------------------------------------------------
def vgae_forward(a_hat, x, params, eps, *, matmul_dtype=jnp.float32,
                 row_block=None):
    """VGAE forward. matmul_dtype=jnp.bfloat16 uses the bf16 MXU path
    (v6e/v7x fast path); elementwise math always stays f32."""
    n, cin = x.shape
    hdim = params["w1"].shape[1]
    co = params["wmu"].shape[1]

    # MXU/lane-friendly padded dims
    cin_p = _round_up(cin, 128)
    h_p = _round_up(hdim, 128)
    co_p = _round_up(co, 128)
    if row_block is not None:
        row_block = _round_up(row_block, 8)
        n_p = _round_up(n, row_block)
    else:
        n_p = _round_up(n, 8)

    # zero-pad once in the wrapper (exact: padded rows/cols contribute zeros)
    a_p = _pad2(a_hat.astype(jnp.float32), n_p, n_p)
    x_p = _pad2(x.astype(jnp.float32), n_p, cin_p)
    w1_p = _pad2(params["w1"], cin_p, h_p)
    b1_p = _pad2(params["b1"], 1, h_p)
    # fuse the two heads into one [H, 2*Co_pad] weight / [1, 2*Co_pad] bias
    wh_p = jnp.concatenate([_pad2(params["wmu"], h_p, co_p),
                            _pad2(params["wlv"], h_p, co_p)], axis=1)
    bh_p = jnp.concatenate([_pad2(params["bmu"], 1, co_p),
                            _pad2(params["blv"], 1, co_p)], axis=1)
    eps_p = _pad2(eps.astype(jnp.float32), n_p, co_p)

    out_sd = jax.ShapeDtypeStruct((n_p, co_p), jnp.float32)

    if row_block is None or n_p <= row_block:
        # --------------------- single-block fused kernel ---------------------
        flops = int(2 * (n_p * cin_p * h_p + n_p * n_p * h_p
                         + n_p * h_p * 2 * co_p + n_p * n_p * 2 * co_p))
        bytes_acc = int(4 * (a_p.size + x_p.size + w1_p.size + b1_p.size
                             + wh_p.size + bh_p.size + eps_p.size
                             + 3 * n_p * co_p))
        kern = functools.partial(_vgae_fused_kernel, co_pad=co_p,
                                 mm_dtype=matmul_dtype)
        z_p, mu_p, lv_p = pl.pallas_call(
            kern,
            out_shape=(out_sd, out_sd, out_sd),
            in_specs=[_full_spec(t.shape)
                      for t in (a_p, x_p, w1_p, b1_p, wh_p, bh_p, eps_p)],
            out_specs=(_full_spec((n_p, co_p)),) * 3,
            cost_estimate=pl.CostEstimate(flops=flops,
                                          transcendentals=int(n_p * co_p),
                                          bytes_accessed=bytes_acc),
        )(a_p, x_p, w1_p, b1_p, wh_p, bh_p, eps_p)
    else:
        # ------------------ row-tiled two-pass pipeline ----------------------
        tm = row_block
        nb = n_p // tm

        # pass 1: per row slab of A_hat -> hw = relu(A@xW1 + b1) @ Wheads
        p1_block_bytes = 4 * (tm * n_p + n_p * cin_p + cin_p * h_p + h_p
                              + h_p * 2 * co_p + tm * 2 * co_p)
        kern1 = functools.partial(_vgae_rows_layer1_kernel,
                                  mm_dtype=matmul_dtype)
        hw = pl.pallas_call(
            kern1,
            out_shape=jax.ShapeDtypeStruct((n_p, 2 * co_p), jnp.float32),
            grid=(nb,),
            in_specs=[
                pl.BlockSpec((tm, n_p), lambda i: (i, 0)),        # A_hat slab
                pl.BlockSpec((n_p, cin_p), lambda i: (0, 0)),     # x (full)
                pl.BlockSpec((cin_p, h_p), lambda i: (0, 0)),     # W1
                pl.BlockSpec((1, h_p), lambda i: (0, 0)),         # b1
                pl.BlockSpec((h_p, 2 * co_p), lambda i: (0, 0)),  # Wmu|Wlv
            ],
            out_specs=pl.BlockSpec((tm, 2 * co_p), lambda i: (i, 0)),
            compiler_params=pltpu.CompilerParams(
                dimension_semantics=("parallel",),
                vmem_limit_bytes=_maybe_vmem_limit(p1_block_bytes)),
            cost_estimate=pl.CostEstimate(
                flops=int(2 * (nb * n_p * cin_p * h_p + n_p * n_p * h_p
                               + n_p * h_p * 2 * co_p)),
                transcendentals=0,
                bytes_accessed=int(4 * (n_p * n_p
                                        + nb * (n_p * cin_p + cin_p * h_p
                                                + h_p + h_p * 2 * co_p)
                                        + n_p * 2 * co_p))),
        )(a_p, x_p, w1_p, b1_p, wh_p)

        # pass 2: per row slab of A_hat -> both heads + reparameterize
        p2_block_bytes = 4 * (tm * n_p + n_p * 2 * co_p + 2 * co_p
                              + tm * co_p + 3 * tm * co_p)
        kern2 = functools.partial(_vgae_rows_heads_kernel, co_pad=co_p,
                                  mm_dtype=matmul_dtype)
        z_p, mu_p, lv_p = pl.pallas_call(
            kern2,
            out_shape=(out_sd, out_sd, out_sd),
            grid=(nb,),
            in_specs=[
                pl.BlockSpec((tm, n_p), lambda i: (i, 0)),          # A_hat slab
                pl.BlockSpec((n_p, 2 * co_p), lambda i: (0, 0)),    # hw (full)
                pl.BlockSpec((1, 2 * co_p), lambda i: (0, 0)),      # bmu|blv
                pl.BlockSpec((tm, co_p), lambda i: (i, 0)),         # eps slab
            ],
            out_specs=(pl.BlockSpec((tm, co_p), lambda i: (i, 0)),
                       pl.BlockSpec((tm, co_p), lambda i: (i, 0)),
                       pl.BlockSpec((tm, co_p), lambda i: (i, 0))),
            compiler_params=pltpu.CompilerParams(
                dimension_semantics=("parallel",),
                vmem_limit_bytes=_maybe_vmem_limit(p2_block_bytes)),
            cost_estimate=pl.CostEstimate(
                flops=int(2 * n_p * n_p * 2 * co_p),
                transcendentals=int(n_p * co_p),
                bytes_accessed=int(4 * (n_p * n_p
                                        + nb * (n_p * 2 * co_p + 2 * co_p)
                                        + n_p * co_p + 3 * n_p * co_p))),
        )(a_p, hw, bh_p, eps_p)

    # slice away padding (plain XLA glue)
    return z_p[:n, :co], mu_p[:n, :co], lv_p[:n, :co]


# ----------------------------------------------------------------------------
# plain-JAX glue: normalized dense adjacency A_hat = D^-1/2 (A + I) D^-1/2
# ----------------------------------------------------------------------------
def build_norm_adjacency(edge_index, num_nodes):
    src, dst = edge_index[0], edge_index[1]
    a = jnp.zeros((num_nodes, num_nodes), jnp.float32)
    a = a.at[dst, src].add(1.0)
    a = a + jnp.eye(num_nodes, dtype=jnp.float32)        # self loops
    deg = a.sum(axis=1)
    d_inv_sqrt = jnp.where(deg > 0, jax.lax.rsqrt(deg), 0.0)
    return d_inv_sqrt[:, None] * a * d_inv_sqrt[None, :]


def init_params(key, in_channels, hidden_dim, out_channels):
    k1, k2, k3 = jax.random.split(key, 3)
    # GCNConv lin applied as x @ W^T -> store transposed [in, out]; biases zero.
    limit = math.sqrt(6.0 / (in_channels + hidden_dim))
    w1 = jax.random.uniform(k1, (in_channels, hidden_dim), jnp.float32,
                            -limit, limit)
    # conv_mu / conv_logvar weights: nn.init.normal_(std=0.01)
    wmu = 0.01 * jax.random.normal(k2, (hidden_dim, out_channels), jnp.float32)
    wlv = 0.01 * jax.random.normal(k3, (hidden_dim, out_channels), jnp.float32)
    return {
        "w1": w1, "b1": jnp.zeros((1, hidden_dim), jnp.float32),
        "wmu": wmu, "bmu": jnp.zeros((1, out_channels), jnp.float32),
        "wlv": wlv, "blv": jnp.zeros((1, out_channels), jnp.float32),
    }


def reference_forward(a_hat, x, params, eps):
    h = jnp.maximum(a_hat @ (x @ params["w1"]) + params["b1"], 0.0)
    mu = a_hat @ (h @ params["wmu"]) + params["bmu"]
    lv = a_hat @ (h @ params["wlv"]) + params["blv"]
    z = mu + eps * jnp.exp(0.5 * lv)
    return z, mu, lv


# ----------------------------------------------------------------------------
# demo / validation
# ----------------------------------------------------------------------------
def _run_case(key, num_nodes, in_channels, hidden_dim, out_channels, num_edges,
              matmul_dtype, row_block, rtol, atol, name):
    k_edges, k_x, k_params, k_eps = jax.random.split(key, 4)
    src = jax.random.randint(k_edges, (num_edges,), 0, num_nodes)
    dst = jax.random.randint(jax.random.fold_in(k_edges, 1),
                             (num_edges,), 0, num_nodes)
    edge_index = jnp.stack([src, dst], axis=0)                 # [2, E]
    x = jax.random.normal(k_x, (num_nodes, in_channels), jnp.float32)
    params = init_params(k_params, in_channels, hidden_dim, out_channels)
    # TODO(synk): eps (torch.randn_like) is drawn host-side with a fixed key
    # instead of inside the kernel, so results are deterministic.
    eps = jax.random.normal(k_eps, (num_nodes, out_channels), jnp.float32)
    a_hat = build_norm_adjacency(edge_index, num_nodes)

    z, mu, lv = jax.block_until_ready(
        vgae_forward(a_hat, x, params, eps,
                     matmul_dtype=matmul_dtype, row_block=row_block))

    z_ref, mu_ref, lv_ref = reference_forward(a_hat, x, params, eps)
    np.testing.assert_allclose(np.asarray(z), np.asarray(z_ref),
                               rtol=rtol, atol=atol, err_msg=name)
    np.testing.assert_allclose(np.asarray(mu), np.asarray(mu_ref),
                               rtol=rtol, atol=atol, err_msg=name)
    np.testing.assert_allclose(np.asarray(lv), np.asarray(lv_ref),
                               rtol=rtol, atol=atol, err_msg=name)


if __name__ == "__main__":
    root = jax.random.PRNGKey(0)
    k_small, k_large = jax.random.split(root, 2)

    # 1) toy graph, fused single-block kernel, f32 MXU path
    _run_case(k_small, num_nodes=16, in_channels=8, hidden_dim=32,
              out_channels=16, num_edges=40, matmul_dtype=jnp.float32,
              row_block=None, rtol=1e-4, atol=1e-5, name="fused-f32")

    # 2) same toy graph, bf16 MXU operands (v6e/v7x fast path; elementwise f32)
    _run_case(k_small, num_nodes=16, in_channels=8, hidden_dim=32,
              out_channels=16, num_edges=40, matmul_dtype=jnp.bfloat16,
              row_block=None, rtol=5e-2, atol=5e-2, name="fused-bf16")

    # 3) larger graph, row-tiled two-pass pipeline (parallel rows, pipelined
    #    A_hat slab DMA), f32 MXU path
    _run_case(k_large, num_nodes=512, in_channels=64, hidden_dim=128,
              out_channels=64, num_edges=2048, matmul_dtype=jnp.float32,
              row_block=128, rtol=2e-3, atol=2e-3, name="tiled-f32")

    print("KERNEL_OK")
</pallas_src>

<mosaic_0001>
module attributes {stable_mosaic.version = 11 : i64} {
  func.func @_vgae_fused_kernel(%arg0: memref<16x16xf32, #tpu.memory_space<vmem>>, %arg1: memref<16x128xf32, #tpu.memory_space<vmem>>, %arg2: memref<128x128xf32, #tpu.memory_space<vmem>>, %arg3: memref<1x128xf32, #tpu.memory_space<vmem>>, %arg4: memref<128x256xf32, #tpu.memory_space<vmem>>, %arg5: memref<1x256xf32, #tpu.memory_space<vmem>>, %arg6: memref<16x128xf32, #tpu.memory_space<vmem>>, %arg7: memref<16x128xf32, #tpu.memory_space<vmem>>, %arg8: memref<16x128xf32, #tpu.memory_space<vmem>>, %arg9: memref<16x128xf32, #tpu.memory_space<vmem>>) attributes {dimension_semantics = [], scalar_prefetch = 0 : i64, scratch_operands = 0 : i64, tpu.core_type = #tpu.core_type<tc>} {
    %c0 = arith.constant 0 : index
    %c0_0 = arith.constant 0 : index
    %0 = vector.load %arg0[%c0, %c0_0] : memref<16x16xf32, #tpu.memory_space<vmem>>, vector<16x16xf32>
    %c0_1 = arith.constant 0 : index
    %c0_2 = arith.constant 0 : index
    %1 = vector.load %arg1[%c0_1, %c0_2] : memref<16x128xf32, #tpu.memory_space<vmem>>, vector<16x128xf32>
    %c0_3 = arith.constant 0 : index
    %c0_4 = arith.constant 0 : index
    %2 = vector.load %arg2[%c0_3, %c0_4] : memref<128x128xf32, #tpu.memory_space<vmem>>, vector<128x128xf32>
    %cst = arith.constant dense<0.000000e+00> : vector<16x128xf32>
    %3 = tpu.matmul %1, %2, %cst {dimension_numbers = #tpu.dot_dimension_numbers<[1], [0], [0], [1], [0, 0, 1, 1], [], []>} : vector<16x128xf32>, vector<128x128xf32>, vector<16x128xf32> -> vector<16x128xf32>
    %cst_5 = arith.constant dense<0.000000e+00> : vector<16x128xf32>
    %4 = tpu.matmul %0, %3, %cst_5 {dimension_numbers = #tpu.dot_dimension_numbers<[1], [0], [0], [1], [0, 0, 1, 1], [], []>} : vector<16x16xf32>, vector<16x128xf32>, vector<16x128xf32> -> vector<16x128xf32>
    %c0_6 = arith.constant 0 : index
    %c0_7 = arith.constant 0 : index
    %5 = vector.load %arg3[%c0_6, %c0_7] : memref<1x128xf32, #tpu.memory_space<vmem>>, vector<1x128xf32>
    %6 = vector.broadcast %5 : vector<1x128xf32> to vector<16x128xf32>
    %7 = arith.addf %4, %6 : vector<16x128xf32>
    %cst_8 = arith.constant 0.000000e+00 : f32
    %8 = vector.broadcast %cst_8 : f32 to vector<16x128xf32>
    %9 = arith.maximumf %7, %8 : vector<16x128xf32>
    %c0_9 = arith.constant 0 : index
    %c0_10 = arith.constant 0 : index
    %10 = vector.load %arg4[%c0_9, %c0_10] : memref<128x256xf32, #tpu.memory_space<vmem>>, vector<128x256xf32>
    %cst_11 = arith.constant dense<0.000000e+00> : vector<16x256xf32>
    %11 = tpu.matmul %9, %10, %cst_11 {dimension_numbers = #tpu.dot_dimension_numbers<[1], [0], [0], [1], [0, 0, 1, 1], [], []>} : vector<16x128xf32>, vector<128x256xf32>, vector<16x256xf32> -> vector<16x256xf32>
    %cst_12 = arith.constant dense<0.000000e+00> : vector<16x256xf32>
    %12 = tpu.matmul %0, %11, %cst_12 {dimension_numbers = #tpu.dot_dimension_numbers<[1], [0], [0], [1], [0, 0, 1, 1], [], []>} : vector<16x16xf32>, vector<16x256xf32>, vector<16x256xf32> -> vector<16x256xf32>
    %c0_13 = arith.constant 0 : index
    %c0_14 = arith.constant 0 : index
    %13 = vector.load %arg5[%c0_13, %c0_14] : memref<1x256xf32, #tpu.memory_space<vmem>>, vector<1x256xf32>
    %14 = vector.broadcast %13 : vector<1x256xf32> to vector<16x256xf32>
    %15 = arith.addf %12, %14 : vector<16x256xf32>
    %16 = vector.extract_strided_slice %15 {offsets = [0, 0], sizes = [16, 128], strides = [1, 1]} : vector<16x256xf32> to vector<16x128xf32>
    %17 = vector.extract_strided_slice %15 {offsets = [0, 128], sizes = [16, 128], strides = [1, 1]} : vector<16x256xf32> to vector<16x128xf32>
    %c0_15 = arith.constant 0 : index
    %c0_16 = arith.constant 0 : index
    %18 = vector.load %arg6[%c0_15, %c0_16] : memref<16x128xf32, #tpu.memory_space<vmem>>, vector<16x128xf32>
    %cst_17 = arith.constant 5.000000e-01 : f32
    %19 = vector.broadcast %cst_17 : f32 to vector<16x128xf32>
    %20 = arith.mulf %19, %17 : vector<16x128xf32>
    %21 = math.exp %20 : vector<16x128xf32>
    %22 = arith.mulf %18, %21 : vector<16x128xf32>
    %23 = arith.addf %16, %22 : vector<16x128xf32>
    %c0_18 = arith.constant 0 : index
    %c0_19 = arith.constant 0 : index
    %24 = vector.load %arg7[%c0_18, %c0_19] : memref<16x128xf32, #tpu.memory_space<vmem>>, vector<16x128xf32>
    tpu.vector_store %arg7[%c0_18, %c0_19], %23 {strides = array<i32>} : memref<16x128xf32, #tpu.memory_space<vmem>>, vector<16x128xf32>,
    %c0_20 = arith.constant 0 : index
    %c0_21 = arith.constant 0 : index
    %25 = vector.load %arg8[%c0_20, %c0_21] : memref<16x128xf32, #tpu.memory_space<vmem>>, vector<16x128xf32>
    tpu.vector_store %arg8[%c0_20, %c0_21], %16 {strides = array<i32>} : memref<16x128xf32, #tpu.memory_space<vmem>>, vector<16x128xf32>,
    %c0_22 = arith.constant 0 : index
    %c0_23 = arith.constant 0 : index
    %26 = vector.load %arg9[%c0_22, %c0_23] : memref<16x128xf32, #tpu.memory_space<vmem>>, vector<16x128xf32>
    tpu.vector_store %arg9[%c0_22, %c0_23], %17 {strides = array<i32>} : memref<16x128xf32, #tpu.memory_space<vmem>>, vector<16x128xf32>,
    return
  }
}

</mosaic_0001>

<bundles_post_ra>
// kernel: tpu_custom_call.1
= control target key start
LH: loop header
LB: loop body
LE: loop exit
PB: predicated region body
PF: predicated region fallthrough
CT: control target
= control target key end

     0   :  { %15 = vsyncpa [#allocation3], 0  ;;  %s1068_s0 = inlined_call_operand.hbm [shape: f32[16,16], index: 0, kind: input, shape index: {}]   ;;  %s1069_s1 = inlined_call_operand.hbm [shape: f32[16,128], index: 1, kind: input, shape index: {}]   ;;  %s1070_s2 = inlined_call_operand.hbm [shape: f32[128,128], index: 2, kind: input, shape index: {}]   ;;  %s1071_s3 = inlined_call_operand.vmem [shape: f32[1,128], index: 3, kind: input, shape index: {}]   ;;  %s1072_s4 = inlined_call_operand.hbm [shape: f32[128,256], index: 4, kind: input, shape index: {}]   ;;  %s1073_s5 = inlined_call_operand.vmem [shape: f32[1,256], index: 5, kind: input, shape index: {}]   ;;  %s1074_s6 = inlined_call_operand.vmem [shape: f32[16,128], index: 6, kind: input, shape index: {}]   ;;  %s1075_s7 = inlined_call_operand.hbm [shape: f32[16,128], index: 7, kind: output, shape index: {0}]   ;;  %s1076_s8 = inlined_call_operand.hbm [shape: f32[16,128], index: 8, kind: output, shape index: {1}]   ;;  %s1077_s9 = inlined_call_operand.hbm [shape: f32[16,128], index: 9, kind: output, shape index: {2}]  }
   0x1   :  { %16 = vsyncpa [#allocation6], 0 }
   0x2   :  { %17 = vsyncpa [#allocation9], 0 }
   0x3   :  { %18 = vsyncpa [#allocation4], 0 }
   0x4   :  { %19 = vsyncpa [#allocation12], 0  ;;  %s859_s30 = smov [#allocation5]   ;;  %s860_s11 = smov [#allocation2]  }
   0x5   :  { %s37_s10 = sshll.u32 %s859_s30, 4  ;;  %s25_s12 = sshll.u32 %s860_s11, 4  ;;  %s38_s10 = int_to_ptr.vmem [resolvable:$true] %s37_s10  ;;  %s921_s12 = int_to_ptr.vmem [resolvable:$true] %s25_s12 }
   0x6   :  { %s695_s15 = scalar_lea.hbm %s1069_s1, 256 }
   0x7   :  { %p696_p0 = scmp.ne.s32.totalorder %s1069_s1, %s695_s15  ;;  %p699_p1 = scmp.lt.u32.totalorder %s695_s15, %s1069_s1 }
   0x9   :  { %p701_p2 = pnand %p699_p1, %p696_p0 }
   0xb   :  { %704 = shalt.err (!%p701_p2)
}
   0xc   :  { %s705_s20 = scalar_lea.vmem %s38_s10, 256  ;;  %p710_p4 = scmp.lt.s32.totalorder %s38_s10, %s38_s10 }
   0xd   :  { %p706_p3 = scmp.ne.s32.totalorder %s38_s10, %s705_s20  ;;  %p711_p5 = scmp.lt.s32.totalorder %s705_s20, %s705_s20 }
   0xf   :  { %p712_p6 = por %p711_p5, %p710_p4 }
  0x11   :  { %p713_p7 = pnand %p712_p6, %p706_p3 }
  0x13   :  { %716 = shalt.err (!%p713_p7)
}
  0x14   :  { %s861_s21 = smov 128   ;;  %s862_s22 = smov 8  }
  0x15   :  { %43 = dma.hbm_to_vmem [thread:$0]  %s1069_s1, 256, %s38_s10, [#allocation6], %s861_s21, %s861_s21, %s862_s22  }
  0x16   :  { %s717_s27 = scalar_lea.hbm %s1068_s0, 256 }
  0x17   :  { %p718_p8 = scmp.ne.s32.totalorder %s1068_s0, %s717_s27  ;;  %p721_p9 = scmp.lt.u32.totalorder %s717_s27, %s1068_s0 }
  0x19   :  { %p723_p10 = pnand %p721_p9, %p718_p8 }
  0x1b   :  { %726 = shalt.err (!%p723_p10)
}
  0x1c   :  { %s727_s13 = scalar_lea.vmem %s921_s12, 256  ;;  %p732_p12 = scmp.lt.s32.totalorder %s921_s12, %s921_s12 }
  0x1d   :  { %p728_p11 = scmp.ne.s32.totalorder %s921_s12, %s727_s13  ;;  %p733_p13 = scmp.lt.s32.totalorder %s727_s13, %s727_s13 }
  0x1f   :  { %p734_p0 = por %p733_p13, %p732_p12 }
  0x21   :  { %p735_p1 = pnand %p734_p0, %p728_p11 }
  0x23   :  { %738 = shalt.err (!%p735_p1)
}
  0x24   :  { %31 = dma.hbm_to_vmem [thread:$0]  %s1068_s0, 256, %s921_s12, [#allocation3], %s861_s21, %s861_s21, %s862_s22  }
  0x25   :  { %s863_s14 = smov [#allocation7]   ;;  %s864_s16 = smov [#allocation8]  }
  0x26   :  { %s49_s15 = sshll.u32 %s863_s14, 4  ;;  %s63_s17 = sshll.u32 %s864_s16, 4  ;;  %s50_s15 = int_to_ptr.vmem [resolvable:$true] %s49_s15  ;;  %s958_s17 = int_to_ptr.vmem [resolvable:$true] %s63_s17 }
  0x27   :  { %s739_s20 = scalar_lea.hbm %s1070_s2, 2048 }
  0x28   :  { %p740_p2 = scmp.ne.s32.totalorder %s1070_s2, %s739_s20  ;;  %p743_p3 = scmp.lt.u32.totalorder %s739_s20, %s1070_s2 }
  0x2a   :  { %p745_p4 = pnand %p743_p3, %p740_p2 }
  0x2c   :  { %748 = shalt.err (!%p745_p4)
}
  0x2d   :  { %s749_s0 = scalar_lea.vmem %s50_s15, 2048  ;;  %p754_p6 = scmp.lt.s32.totalorder %s50_s15, %s50_s15 }
  0x2e   :  { %p750_p5 = scmp.ne.s32.totalorder %s50_s15, %s749_s0  ;;  %p755_p7 = scmp.lt.s32.totalorder %s749_s0, %s749_s0 }
  0x30   :  { %p756_p8 = por %p755_p7, %p754_p6 }
  0x32   :  { %p757_p9 = pnand %p756_p8, %p750_p5 }
  0x34   :  { %760 = shalt.err (!%p757_p9)
}
  0x35   :  { %55 = dma.hbm_to_vmem [thread:$0]  %s1070_s2, 2048, %s50_s15, [#allocation6], %s861_s21, %s861_s21, %s862_s22  }
  0x36   :  { %s761_s30 = scalar_lea.hbm %s1072_s4, 4096 }
  0x37   :  { %p762_p10 = scmp.ne.s32.totalorder %s1072_s4, %s761_s30  ;;  %p765_p11 = scmp.lt.u32.totalorder %s761_s30, %s1072_s4 }
  0x39   :  { %p767_p12 = pnand %p765_p11, %p762_p10 }
  0x3b   :  { %770 = shalt.err (!%p767_p12)
}
  0x3c   :  { %s771_s14 = scalar_lea.vmem %s958_s17, 4096  ;;  %p776_p0 = scmp.lt.s32.totalorder %s958_s17, %s958_s17 }
  0x3d   :  { %p772_p13 = scmp.ne.s32.totalorder %s958_s17, %s771_s14  ;;  %p777_p1 = scmp.lt.s32.totalorder %s771_s14, %s771_s14 }
  0x3f   :  { %p778_p2 = por %p777_p1, %p776_p0 }
  0x41   :  { %p779_p3 = pnand %p778_p2, %p772_p13 }
  0x43   :  { %782 = shalt.err (!%p779_p3)
}
  0x44   :  { %s865_s2 = smov 256   ;;  %s866_s15 = smov 16  }
  0x45   :  { %69 = dma.hbm_to_vmem [thread:$0]  %s1072_s4, 4096, %s958_s17, [#allocation9], %s865_s2, %s865_s2, %s866_s15  }
  0x46   :  { %849 = dma.done.wait [#allocation3], 256  }
  0x47   :  { %850 = vsyncadd [#allocation3], 4294967040 }
  0x48   :  { %851 = dma.done.wait [#allocation6], 2304  }
  0x49   :  { %852 = vsyncadd [#allocation6], 4294964992 }
  0x4a   :  { %853 = dma.done.wait [#allocation9], 4096  }
  0x4b   :  { %854 = vsyncadd [#allocation9], 4294963200  ;;  %v90_v0 = vld [vmem:[#allocation7] sm:$0xff]  ;;  %v91_v1 = vld [vmem:[#allocation7 + $0x8] sm:$0xff]  ;;  %vm188_vm0 = vcmask 130048   ;;  %s868_s20 = smov [#allocation11]  }
  0x4c   :  { %v92_v2 = vld [vmem:[#allocation7 + $0x10] sm:$0xff]  ;;  %v607_v3 = vpack.c.bf16 %v91_v1, %v90_v0  ;;  %v93_v4 = vld [vmem:[#allocation7 + $0x18] sm:$0xff]  ;;  %v94_v6 = vld [vmem:[#allocation7 + $0x20] sm:$0xff]  ;;  %s505_s23 = sshll.u32 %s868_s20, 4  ;;  %s869_s24 = smov [#allocation13]   ;;  %s506_s23 = int_to_ptr.vmem [resolvable:$true] %s505_s23 }
  0x4d   :  { %v611_v5 = vpack.c.bf16 %v93_v4, %v92_v2  ;;  %v95_v7 = vld [vmem:[#allocation7 + $0x28] sm:$0xff]  ;;  %v88_v9 = vld [vmem:[#allocation5] sm:$0xff]  ;;  %v97_v11 = vld [vmem:[#allocation7 + $0x38] sm:$0xff]  ;;  %s517_s25 = sshll.u32 %s869_s24, 4  ;;  %p788_p5 = scmp.lt.s32.totalorder %s506_s23, %s506_s23  ;;  %s1010_s25 = int_to_ptr.vmem [resolvable:$true] %s517_s25 }
  0x4e   :  { %608 = vmatprep.subr.bf16.mxu0 %v607_v3  ;;  %v615_v8 = vpack.c.bf16 %v95_v7, %v94_v6  ;;  %v96_v10 = vld [vmem:[#allocation7 + $0x30] sm:$0xff]  ;;  %597 = vmatprep.mubr.f32.mxu0 %v88_v9  ;;  %v98_v13 = vld [vmem:[#allocation7 + $0x40] sm:$0xff]  ;;  %v99_v14 = vld [vmem:[#allocation7 + $0x48] sm:$0xff] }
  0x4f   :  { %610 = vmatpush3.bf16.msra.mxu0 %v607_v3  ;;  %v619_v12 = vpack.c.bf16 %v97_v11, %v96_v10  ;;  %v623_v15 = vpack.c.bf16 %v99_v14, %v98_v13  ;;  %v100_v16 = vld [vmem:[#allocation7 + $0x50] sm:$0xff]  ;;  %v101_v17 = vld [vmem:[#allocation7 + $0x58] sm:$0xff]  ;;  %v102_v19 = vld [vmem:[#allocation7 + $0x60] sm:$0xff] }
  0x50   :  { %612 = vmatprep.subr.bf16.mxu0 %v611_v5  ;;  %v627_v18 = vpack.c.bf16 %v101_v17, %v100_v16  ;;  %v103_v20 = vld [vmem:[#allocation7 + $0x68] sm:$0xff]  ;;  %v104_v22 = vld [vmem:[#allocation7 + $0x70] sm:$0xff]  ;;  %v105_v23 = vld [vmem:[#allocation7 + $0x78] sm:$0xff] }
  0x51   :  { %v631_v21 = vpack.c.bf16 %v103_v20, %v102_v19  ;;  %v635_v24 = vpack.c.bf16 %v105_v23, %v104_v22  ;;  %v89_v25 = vld [vmem:[#allocation5 + $0x8] sm:$0xff]  ;;  %v992_v26 = vld [vmem:[#allocation2] sm:$0xff]  ;;  %v273_v27 = vld [vmem:[#allocation8 + $0x8] sm:$0xff] }
  0x52   :  { %604 = vmatprep.mubr.msk.f32.mxu1 %vm188_vm0, %v992_v26  ;;  %v275_v28 = vld [vmem:[#allocation8 + $0x18] sm:$0xff]  ;;  %v272_v33 = vld [vmem:[#allocation8] sm:$0xff]  ;;  %v274_v34 = vld [vmem:[#allocation8 + $0x10] sm:$0xff] }
  0x53   :  { %614 = vmatpush3.bf16.msra.mxu0 %v611_v5  ;;  %v643_v32 = vpack.c.bf16 %v275_v28, %v273_v27  ;;  %v277_v35 = vld [vmem:[#allocation8 + $0x28] sm:$0xff]  ;;  %v279_v36 = vld [vmem:[#allocation8 + $0x38] sm:$0xff]  ;;  %v645_v38 = vpack.c.bf16 %v274_v34, %v272_v33  ;;  %v276_v40 = vld [vmem:[#allocation8 + $0x20] sm:$0xff] }
  0x54   :  { %616 = vmatprep.subr.bf16.mxu0 %v615_v8  ;;  %v996_v37 = vld [vmem:[#allocation2 + $0x8] sm:$0xff]  ;;  %v647_v39 = vpack.c.bf16 %v279_v36, %v277_v35  ;;  %v278_v41 = vld [vmem:[#allocation8 + $0x30] sm:$0xff]  ;;  %v283_v43 = vld [vmem:[#allocation8 + $0x58] sm:$0xff] }
  0x55   :  { %v281_v42 = vld [vmem:[#allocation8 + $0x48] sm:$0xff]  ;;  %v649_v44 = vpack.c.bf16 %v278_v41, %v276_v40  ;;  %v280_v46 = vld [vmem:[#allocation8 + $0x40] sm:$0xff]  ;;  %v282_v47 = vld [vmem:[#allocation8 + $0x50] sm:$0xff] }
  0x56   :  { %v651_v45 = vpack.c.bf16 %v283_v43, %v281_v42  ;;  %v285_v48 = vld [vmem:[#allocation8 + $0x68] sm:$0xff]  ;;  %v287_v49 = vld [vmem:[#allocation8 + $0x78] sm:$0xff]  ;;  %v653_v50 = vpack.c.bf16 %v282_v47, %v280_v46  ;;  %v284_v52 = vld [vmem:[#allocation8 + $0x60] sm:$0xff] }
  0x57   :  { %618 = vmatpush3.bf16.msra.mxu0 %v615_v8  ;;  %v655_v51 = vpack.c.bf16 %v287_v49, %v285_v48  ;;  %v286_v53 = vld [vmem:[#allocation8 + $0x70] sm:$0xff]  ;;  %v289_v54 = vld [vmem:[#allocation8 + $0x88] sm:$0xff]  ;;  %v291_v55 = vld [vmem:[#allocation8 + $0x98] sm:$0xff] }
  0x58   :  { %620 = vmatprep.subr.bf16.mxu0 %v619_v12  ;;  %v657_v56 = vpack.c.bf16 %v286_v53, %v284_v52  ;;  %v659_v57 = vpack.c.bf16 %v291_v55, %v289_v54  ;;  %v288_v58 = vld [vmem:[#allocation8 + $0x80] sm:$0xff]  ;;  %v290_v59 = vld [vmem:[#allocation8 + $0x90] sm:$0xff]  ;;  %v293_v60 = vld [vmem:[#allocation8 + $0xa8] sm:$0xff] }
  0x59   :  { %v295_v61 = vld [vmem:[#allocation8 + $0xb8] sm:$0xff]  ;;  %v661_v62 = vpack.c.bf16 %v290_v59, %v288_v58  ;;  %v292_v0 = vld [vmem:[#allocation8 + $0xa0] sm:$0xff]  ;;  %v294_v1 = vld [vmem:[#allocation8 + $0xb0] sm:$0xff] }
  0x5a   :  { %v663_v63 = vpack.c.bf16 %v295_v61, %v293_v60  ;;  %v297_v2 = vld [vmem:[#allocation8 + $0xc8] sm:$0xff]  ;;  %v299_v3 = vld [vmem:[#allocation8 + $0xd8] sm:$0xff]  ;;  %v665_v4 = vpack.c.bf16 %v294_v1, %v292_v0  ;;  %v296_v6 = vld [vmem:[#allocation8 + $0xc0] sm:$0xff] }
  0x5b   :  { %622 = vmatpush3.bf16.msra.mxu0 %v619_v12  ;;  %v667_v5 = vpack.c.bf16 %v299_v3, %v297_v2  ;;  %v298_v7 = vld [vmem:[#allocation8 + $0xd0] sm:$0xff]  ;;  %v301_v9 = vld [vmem:[#allocation8 + $0xe8] sm:$0xff]  ;;  %v303_v10 = vld [vmem:[#allocation8 + $0xf8] sm:$0xff] }
  0x5c   :  { %624 = vmatprep.subr.bf16.mxu0 %v623_v15  ;;  %v669_v8 = vpack.c.bf16 %v298_v7, %v296_v6  ;;  %v671_v11 = vpack.c.bf16 %v303_v10, %v301_v9  ;;  %v300_v12 = vld [vmem:[#allocation8 + $0xe0] sm:$0xff]  ;;  %v302_v13 = vld [vmem:[#allocation8 + $0xf0] sm:$0xff] }
  0x5d   :  { %v673_v14 = vpack.c.bf16 %v302_v13, %v300_v12  ;;  %v538_v16 = vld [vmem:[%s1071_s3] ss:$0 sm:$0xff] }
  0x5e   :  { %v381_v33 = vld [vmem:[%s1073_s5] sm:$0x3]  ;;  %s783_s5 = scalar_lea.vmem %s506_s23, 256 }
  0x5f   :  { %626 = vmatpush3.bf16.msra.mxu0 %v623_v15  ;;  %v867_v15 = vmov 0.0   ;;  %p784_p4 = scmp.ne.s32.totalorder %s506_s23, %s783_s5  ;;  %p789_p6 = scmp.lt.s32.totalorder %s783_s5, %s783_s5 }
  0x60   :  { %628 = vmatprep.subr.bf16.mxu0 %v627_v18 }
  0x61   :  { %p790_p7 = por %p789_p6, %p788_p5 }
  0x63   :  { %630 = vmatpush3.bf16.msra.mxu0 %v627_v18  ;;  %p791_p8 = pnand %p790_p7, %p784_p4 }
  0x64   :  { %632 = vmatprep.subr.bf16.mxu0 %v631_v21 }
  0x67   :  { %634 = vmatpush3.bf16.msra.mxu0 %v631_v21 }
  0x68   :  { %636 = vmatprep.subr.bf16.mxu0 %v635_v24 }
  0x6b   :  { %638 = vmatpush3.bf16.msra.mxu0 %v635_v24 }
  0x6e   :  { %598 = vmatmul.mubr.f32.vlgmr.msra.gmra.mrb[0].mxu0 %v89_v25 }
  0x6f   :  { %457 = vmatprep.mubr.f32.mxu0 %v867_v15 }
 0x141   :  { %v599_v29 = vpop.f32.mrb[0].mxu0 }
 0x142   :  { %v172_v30 = vpop.f32.mrb[1].mxu0 }
 0x143   :  { %v639_v31 = vpack.c.bf16 %v599_v29, %v172_v30  ;;  %v383_v30 = vlaneseq }
 0x145   :  { %640 = vmatprep.subr.bf16.mxu1 %v639_v31 }
 0x146   :  { %642 = vmatpush3.bf16.msra.mxu1 %v639_v31  ;;  %v384_v31 = vshrl.u32 %v383_v30, 7 }
 0x147   :  { %644 = vmatprep.subr.bf16.mxu1 %v643_v32 }
 0x148   :  { %v385_v32 = vsub.s32 0, %v384_v31  ;;  %v389_v34 = vsub.s32 1, %v384_v31 }
 0x149   :  { %605 = vmatmul.mubr.msk.f32.vlgmr.msra.gmra.mrb[0].mxu1 %vm188_vm0, %v996_v37 }
 0x14a   :  { %646 = vmatpush1.bf16.msra.mxu1 %v645_v38  ;;  %368 = vmatprep.mubr.f32.mxu1 %v867_v15  ;;  %v386_v35 = vrot.slane %v381_v33, %v385_v32  ;;  %v390_v36 = vrot.slane %v381_v33, %v389_v34 }
 0x14b   :  { %648 = vmatprep.subr.bf16.mxu1 %v647_v39 }
 0x14e   :  { %650 = vmatpush1.bf16.msra.mxu1 %v649_v44 }
 0x14f   :  { %652 = vmatprep.subr.bf16.mxu1 %v651_v45 }
 0x152   :  { %654 = vmatpush1.bf16.msra.mxu1 %v653_v50 }
 0x153   :  { %656 = vmatprep.subr.bf16.mxu1 %v655_v51 }
 0x156   :  { %658 = vmatpush1.bf16.msra.mxu1 %v657_v56 }
 0x157   :  { %660 = vmatprep.subr.bf16.mxu1 %v659_v57 }
 0x15a   :  { %662 = vmatpush1.bf16.msra.mxu1 %v661_v62 }
 0x15b   :  { %664 = vmatprep.subr.bf16.mxu1 %v663_v63 }
 0x15e   :  { %666 = vmatpush1.bf16.msra.mxu1 %v665_v4 }
 0x15f   :  { %668 = vmatprep.subr.bf16.mxu1 %v667_v5 }
 0x162   :  { %670 = vmatpush1.bf16.msra.mxu1 %v669_v8 }
 0x163   :  { %672 = vmatprep.subr.bf16.mxu1 %v671_v11 }
 0x166   :  { %674 = vmatpush1.bf16.msra.mxu1 %v673_v14 }
 0x21c   :  { %v606_v17 = vpop.f32.mrb[0].mxu1 }
 0x21d   :  { %v261_v18 = vpop.f32.mrb[1].mxu1  ;;  %v267_v20 = vadd.f32 %v606_v17, %v538_v16 }
 0x21e   :  { %v262_v19 = vadd.f32 %v538_v16, %v261_v18 }
 0x21f   :  { %v271_v22 = vmax.f32 %v267_v20, 0.0 }
 0x220   :  { %v270_v21 = vmax.f32 %v262_v19, 0.0 }
 0x222   :  { %369 = vmatmul.mubr.f32.vlgmr.msra.gmra.mrb[2].mxu1 %v270_v21 }
 0x223   :  { %374 = vmatprep.mubr.f32.mxu1 %v867_v15 }
 0x226   :  { %375 = vmatmul.mubr.f32.gmra.mrb[4].mxu1 %v271_v22 }
 0x2f5   :  { %v370_v23 = vpop.f32.mrb[2].mxu1 }
 0x2f6   :  { %v372_v24 = vpop.f32.mrb[3].mxu1 }
 0x2f9   :  { %v376_v25 = vpop.f32.mrb[4].mxu1 }
 0x2fa   :  { %v677_v27 = vpack.c.bf16 %v376_v25, %v370_v23  ;;  %v378_v28 = vpop.f32.mrb[5].mxu1 }
 0x2fb   :  { %v675_v29 = vpack.c.bf16 %v378_v28, %v372_v24 }
 0x2fd   :  { %676 = vmatprep.subr.bf16.mxu0 %v675_v29 }
 0x2fe   :  { %678 = vmatpush1.bf16.msra.mxu0 %v677_v27 }
 0x301   :  { %541 = vmatmul.mubr.msk.f32.vlgmr.msra.gmra.mrb[2].mxu0 %vm188_vm0, %v992_v26 }
 0x302   :  { %463 = vmatprep.mubr.f32.mxu0 %v867_v15 }
 0x305   :  { %542 = vmatmul.mubr.msk.f32.gmra.mrb[4].mxu0 %vm188_vm0, %v996_v37 }
 0x3d4   :  { %v459_v38 = vpop.f32.mrb[2].mxu0 }
 0x3d5   :  { %v460_v39 = vadd.f32 %v459_v38, %v386_v35  ;;  %v461_v40 = vpop.f32.mrb[3].mxu0 }
 0x3d6   :  { %v462_v41 = vadd.f32 %v461_v40, %v390_v36 }
 0x3d7   :  { %484 = vst [vmem:[#allocation11] sm:$0xff] %v460_v39 }
 0x3d8   :  { %v472_v26 = vmul.f32 0.5, %v462_v41  ;;  %486 = vst [vmem:[#allocation13] sm:$0xff] %v462_v41  ;;  %v465_v37 = vpop.f32.mrb[4].mxu0 }
 0x3d9   :  { %v466_v42 = vadd.f32 %v465_v37, %v386_v35  ;;  %v467_v43 = vpop.f32.mrb[5].mxu0 }
 0x3da   :  { %v474_v44 = vmul.f32 1.442695, %v472_v26  ;;  %v468_v45 = vadd.f32 %v467_v43, %v390_v36 }
 0x3db   :  { %485 = vst [vmem:[#allocation11 + $0x8] sm:$0xff] %v466_v42 }
 0x3dc   :  { %691 = vpow2.f32 %v474_v44  ;;  %v473_v46 = vmul.f32 0.5, %v468_v45  ;;  %487 = vst [vmem:[#allocation13 + $0x8] sm:$0xff] %v468_v45 }
 0x3dd   :  { %794 = shalt.err (!%p791_p8)
}
 0x3de   :  { %s795_s12 = scalar_lea.hbm %s1076_s8, 256 }
 0x3df   :  { %p796_p9 = scmp.ne.s32.totalorder %s1076_s8, %s795_s12  ;;  %p799_p10 = scmp.lt.u32.totalorder %s795_s12, %s1076_s8 }
 0x3e1   :  { %p801_p11 = pnand %p799_p10, %p796_p9 }
 0x3e3   :  { %804 = shalt.err (!%p801_p11)
}
 0x3e4   :  { %511 = dma.vmem_to_hbm [thread:$0]  %s506_s23, 256, %s1076_s8, [#allocation12], %s861_s21, %s861_s21, %s862_s22  }
 0x3e5   :  { %s805_s1 = scalar_lea.vmem %s1010_s25, 256  ;;  %p810_p13 = scmp.lt.s32.totalorder %s1010_s25, %s1010_s25 }
 0x3e6   :  { %p806_p12 = scmp.ne.s32.totalorder %s1010_s25, %s805_s1  ;;  %p811_p0 = scmp.lt.s32.totalorder %s805_s1, %s805_s1 }
 0x3e8   :  { %p812_p1 = por %p811_p0, %p810_p13 }
 0x3ea   :  { %p813_p2 = pnand %p812_p1, %p806_p12 }
 0x3ec   :  { %816 = shalt.err (!%p813_p2)
}
 0x3ed   :  { %s817_s2 = scalar_lea.hbm %s1077_s9, 256 }
 0x3ee   :  { %p818_p3 = scmp.ne.s32.totalorder %s1077_s9, %s817_s2  ;;  %p821_p4 = scmp.lt.u32.totalorder %s817_s2, %s1077_s9 }
 0x3f0   :  { %p823_p5 = pnand %p821_p4, %p818_p3 }
 0x3f2   :  { %826 = shalt.err (!%p823_p5)
}
 0x3f3   :  { %523 = dma.vmem_to_hbm [thread:$0]  %s1010_s25, 256, %s1077_s9, [#allocation12], %s861_s21, %s861_s21, %s862_s22   ;;  %v476_v47 = vmul.f32 1.442695, %v473_v46  ;;  %v692_v49 = vpop.eup %691 }
 0x3f4   :  { %v470_v48 = vld [vmem:[%s1074_s6] sm:$0xff]  ;;  %v471_v51 = vld [vmem:[%s1074_s6 + $0x8] sm:$0xff]  ;;  %s870_s24 = smov [#allocation10]  }
 0x3f5   :  { %693 = vpow2.f32 %v476_v47  ;;  %v478_v50 = vmul.f32 %v692_v49, %v470_v48  ;;  %s493_s5 = sshll.u32 %s870_s24, 4  ;;  %s494_s5 = int_to_ptr.vmem [resolvable:$true] %s493_s5 }
 0x3f6   :  { %s827_s9 = scalar_lea.vmem %s494_s5, 256  ;;  %p832_p7 = scmp.lt.s32.totalorder %s494_s5, %s494_s5 }
 0x3f7   :  { %v480_v52 = vadd.f32 %v478_v50, %v460_v39  ;;  %p828_p6 = scmp.ne.s32.totalorder %s494_s5, %s827_s9  ;;  %p833_p8 = scmp.lt.s32.totalorder %s827_s9, %s827_s9 }
 0x3f9   :  { %482 = vst [vmem:[#allocation10] sm:$0xff] %v480_v52  ;;  %p834_p9 = por %p833_p8, %p832_p7 }
 0x3fb   :  { %p835_p10 = pnand %p834_p9, %p828_p6 }
 0x3ff   :  { %v694_v53 = vpop.eup %693 }
 0x400   :  { %v479_v54 = vmul.f32 %v694_v53, %v471_v51 }
 0x402   :  { %v481_v55 = vadd.f32 %v479_v54, %v466_v42 }
 0x404   :  { %483 = vst [vmem:[#allocation10 + $0x8] sm:$0xff] %v481_v55 }
 0x405   :  { %838 = shalt.err (!%p835_p10)
}
 0x406   :  { %s839_s6 = scalar_lea.hbm %s1075_s7, 256 }
 0x407   :  { %p840_p11 = scmp.ne.s32.totalorder %s1075_s7, %s839_s6  ;;  %p843_p12 = scmp.lt.u32.totalorder %s839_s6, %s1075_s7 }
 0x409   :  { %p845_p13 = pnand %p843_p12, %p840_p11 }
 0x40b   :  { %848 = shalt.err (!%p845_p13)
}
 0x40c   :  { %499 = dma.vmem_to_hbm [thread:$0]  %s494_s5, 256, %s1075_s7, [#allocation4], %s861_s21, %s861_s21, %s862_s22  }
 0x40d   :  { %855 = dma.done.wait [#allocation4], 256  }
 0x40e   :  { %856 = vsyncadd [#allocation4], 4294967040 }
 0x40f   :  { %857 = dma.done.wait [#allocation12], 512  }
 0x410   :  { %858 = vsyncadd [#allocation12], 4294966784 }
 0x411   :  { %533 = vsyncpa [#allocation3], 1 }
 0x412   :  { %534 = vsyncpa [#allocation6], 1 }
 0x413   :  { %535 = vsyncpa [#allocation9], 1 }
 0x414   :  { %536 = vsyncpa [#allocation4], 1 }
 0x415   :  { %537 = vsyncpa [#allocation12], 1 }

</bundles_post_ra>
